<compile_context>
chip_gen: v7x
topology: tpu7x:2x2x1
jax: 0.10.0
libtpu: 0.0.40
codegen_flags: <defaults>
</compile_context>

<pallas_src>
import functools
import math

import numpy as np
import jax
import jax.numpy as jnp
from jax import lax
from jax.experimental import pallas as pl
from jax.experimental.pallas import tpu as pltpu

NCOMP = 9          # 3x3 components per face
LANES = 128        # lane width of the face axis
CHUNK = 8          # sublanes per inner compute step (one vreg per component)
MAX_TILE_B = 256   # sublane-groups per grid step: 9*256*128*4B = 1.125 MiB/array,
                   # (2 in + 2 out + centroid) x 2 buffers ~= 10 MiB (safe on all chips)


def _round_up(x, m):
    return (x + m - 1) // m * m


# ----------------------------------------------------------------------------
# Pallas kernel: Steiner transform + covariance sandwich + centroid for one
# block of faces.  Block refs are (NCOMP, TILE_B, 128) f32 (centroid: 3 comps);
# faces live on the (sublane, lane) plane.
# ----------------------------------------------------------------------------
def _steiner_cov_kernel(tri_ref, cov_ref, t_out_ref, cov_out_ref, cent_out_ref,
                        *, sigma):
    tile_b = tri_ref.shape[1]
    num_chunks = tile_b // CHUNK
    k2 = 1.0 / (2.0 * math.sqrt(3.0))

    def chunk_body(ci, carry):
        o = pl.multiple_of(ci * CHUNK, CHUNK)
        tri = tri_ref[:, pl.ds(o, CHUNK), :]       # (9, 8, 128)
        cl = cov_ref[:, pl.ds(o, CHUNK), :]        # (9, 8, 128)

        # triangle vertices, per coordinate: v[vertex][coord] -> (8, 128)
        v = [[tri[vi * 3 + c] for c in range(3)] for vi in range(3)]

        # centroid; Steiner generators f1, f2
        cx = [(v[0][c] + v[1][c] + v[2][c]) * (1.0 / 3.0) for c in range(3)]
        f1 = [0.5 * (v[2][c] - cx[c]) for c in range(3)]
        f2 = [k2 * (v[1][c] - v[0][c]) for c in range(3)]

        for c in range(3):
            cent_out_ref[c:c + 1, pl.ds(o, CHUNK), :] = cx[c][None]

        d12 = f1[0] * f2[0] + f1[1] * f2[1] + f1[2] * f2[2]
        d11 = f1[0] * f1[0] + f1[1] * f1[1] + f1[2] * f1[2]
        d22 = f2[0] * f2[0] + f2[1] * f2[1] + f2[2] * f2[2]

        # t0 = atan2(2*d12, d11 - d22) / 2  ->  (cos t0, sin t0) without
        # atan2/sin/cos: normalize (x, y) with rsqrt, then a branch-robust
        # half-angle (always divide by the larger of |cos t0|, |sin t0|).
        y = d12 + d12
        x = d11 - d22
        r2 = x * x + y * y
        inv_r = lax.rsqrt(jnp.maximum(r2, 1e-30))
        nonzero = r2 > 1e-30                    # atan2(0, 0) == 0 -> c = 1, s = 0
        cos2t = jnp.where(nonzero, x * inv_r, 1.0)
        sin2t = jnp.where(nonzero, y * inv_r, 0.0)

        c0 = jnp.sqrt(jnp.maximum(0.5 * (1.0 + cos2t), 0.0))   # |cos t0| (cos t0 >= 0)
        s0 = jnp.sqrt(jnp.maximum(0.5 * (1.0 - cos2t), 0.0))   # |sin t0|
        use_c = cos2t >= 0.0
        denom = jnp.where(use_c, c0, s0)                        # >= sqrt(0.5)
        half_inv = 0.5 / jnp.maximum(denom, 1e-6)
        sgn = jnp.where(sin2t >= 0.0, 1.0, -1.0)
        c = jnp.where(use_c, c0, jnp.abs(sin2t) * half_inv)     # cos(t0)
        s = jnp.where(use_c, sin2t * half_inv, sgn * s0)        # sin(t0)

        # axis0 = f1*cos(t0) + f2*sin(t0);  axis1 = -f1*sin(t0) + f2*cos(t0)
        a0 = [f1[i] * c + f2[i] * s for i in range(3)]
        a1 = [f2[i] * c - f1[i] * s for i in range(3)]

        # normal = normalize(cross(axis0, axis1)) * sigma   (F.normalize eps=1e-12)
        crx = a0[1] * a1[2] - a0[2] * a1[1]
        cry = a0[2] * a1[0] - a0[0] * a1[2]
        crz = a0[0] * a1[1] - a0[1] * a1[0]
        n2 = crx * crx + cry * cry + crz * crz
        inv_n = sigma * lax.rsqrt(jnp.maximum(n2, 1e-24))
        n = [crx * inv_n, cry * inv_n, crz * inv_n]

        # transform = stack([2*axis0, 2*axis1, normal], dim=-1)  -> T[row][col]
        T = [[a0[i] + a0[i], a1[i] + a1[i], n[i]] for i in range(3)]
        for i in range(3):
            for j in range(3):
                t_out_ref[i * 3 + j:i * 3 + j + 1, pl.ds(o, CHUNK), :] = T[i][j][None]

        # cov_observation = T @ cov_local @ T^T  (fully unrolled 3x3 per face)
        C = [[cl[i * 3 + j] for j in range(3)] for i in range(3)]
        M = [[T[i][0] * C[0][j] + T[i][1] * C[1][j] + T[i][2] * C[2][j]
              for j in range(3)] for i in range(3)]
        for i in range(3):
            for j in range(3):
                cov_out_ref[i * 3 + j:i * 3 + j + 1, pl.ds(o, CHUNK), :] = (
                    M[i][0] * T[j][0] + M[i][1] * T[j][1] + M[i][2] * T[j][2])[None]
        return carry

    lax.fori_loop(0, num_chunks, chunk_body, 0)


# ----------------------------------------------------------------------------
# Wrappers
# ----------------------------------------------------------------------------
def steiner_transform_and_cov_soa(tri_soa, cov_soa, sigma=0.001):
    """tri_soa, cov_soa: (9, F) float32 component-major ("SoA") layout.
    Returns (transform_soa (9,F), cov_observation_soa (9,F), centroid_soa (3,F))."""
    _, F = tri_soa.shape
    nb = _round_up(-(-F // LANES), CHUNK)            # 128-lane face groups, multiple of 8
    nsteps = max(1, -(-nb // MAX_TILE_B))
    if nb >= 2 * CHUNK:
        nsteps = max(nsteps, 2)                      # >=2 parallel grid steps for megacore
    tile_b = _round_up(-(-nb // nsteps), CHUNK)
    nb = _round_up(nb, tile_b)
    fp = nb * LANES

    def to_blocks(x):
        x = x.astype(jnp.float32)
        return jnp.pad(x, ((0, 0), (0, fp - F))).reshape(NCOMP, nb, LANES)

    kernel = functools.partial(_steiner_cov_kernel, sigma=float(sigma))
    spec9 = pl.BlockSpec((NCOMP, tile_b, LANES), lambda i: (0, i, 0))
    spec3 = pl.BlockSpec((3, tile_b, LANES), lambda i: (0, i, 0))

    t_b, c_b, cent_b = pl.pallas_call(
        kernel,
        out_shape=(jax.ShapeDtypeStruct((NCOMP, nb, LANES), jnp.float32),
                   jax.ShapeDtypeStruct((NCOMP, nb, LANES), jnp.float32),
                   jax.ShapeDtypeStruct((3, nb, LANES), jnp.float32)),
        grid_spec=pltpu.PrefetchScalarGridSpec(
            num_scalar_prefetch=0,
            grid=(nb // tile_b,),
            in_specs=[spec9, spec9],
            out_specs=[spec9, spec9, spec3]),
        compiler_params=pltpu.CompilerParams(
            dimension_semantics=("parallel",)),
    )(to_blocks(tri_soa), to_blocks(cov_soa))

    return (t_b.reshape(NCOMP, fp)[:, :F],
            c_b.reshape(NCOMP, fp)[:, :F],
            cent_b.reshape(3, fp)[:, :F])


def steiner_transform_and_cov(triangles, cov_local, sigma=0.001):
    """triangles, cov_local: (F, 3, 3) float32.
    Returns (transform, cov_observation, centroid) — same math as
    get_transformation_from_triangle_steiner + the covariance sandwich + the
    per-face centroid (xyz_observation) used by Model.forward.
    # TODO(synk): in production feed/consume the (9, F) SoA layout directly and
    # fuse the face gather / cov_local (so3_exp_map + diag(scale)) construction
    # into the kernel to avoid these HBM-side transposes.
    """
    F = triangles.shape[0]
    t_soa, c_soa, cen_soa = steiner_transform_and_cov_soa(
        triangles.reshape(F, NCOMP).T, cov_local.reshape(F, NCOMP).T, sigma)
    return t_soa.T.reshape(F, 3, 3), c_soa.T.reshape(F, 3, 3), cen_soa.T


# ----------------------------------------------------------------------------
# Plain-JAX glue (Rodrigues) and a float64 NumPy reference of the PyTorch math.
# ----------------------------------------------------------------------------
def so3_exp_map(log_rot):
    """Rodrigues formula, log_rot: (F, 3) -> (F, 3, 3)."""
    theta = jnp.sqrt(jnp.maximum(
        jnp.sum(log_rot * log_rot, axis=-1, keepdims=True), 1e-12))
    w = log_rot / theta
    wx, wy, wz = w[..., 0], w[..., 1], w[..., 2]
    zero = jnp.zeros_like(wx)
    K = jnp.stack([jnp.stack([zero, -wz, wy], -1),
                   jnp.stack([wz, zero, -wx], -1),
                   jnp.stack([-wy, wx, zero], -1)], -2)
    st = jnp.sin(theta)[..., None]
    ct = jnp.cos(theta)[..., None]
    return jnp.eye(3, dtype=log_rot.dtype) + st * K + (1.0 - ct) * (K @ K)


def steiner_reference_np(tri, sigma):
    """Float64 reference of get_transformation_from_triangle_steiner.
    Also returns a per-face conditioning ratio for the axis extraction."""
    centroid = tri.mean(axis=-2)
    f1 = 0.5 * (tri[..., 2, :] - centroid)
    f2 = (1.0 / (2.0 * np.sqrt(3.0))) * (tri[..., 1, :] - tri[..., 0, :])
    y = 2.0 * (f1 * f2).sum(-1)
    x = (f1 * f1).sum(-1) - (f2 * f2).sum(-1)
    t0 = (np.arctan2(y, x) / 2.0)[..., None]
    axis0 = f1 * np.cos(t0) + f2 * np.sin(t0)
    axis1 = f1 * np.cos(t0 + np.pi / 2) + f2 * np.sin(t0 + np.pi / 2)
    normal = np.cross(axis0, axis1)
    normal = normal / np.maximum(
        np.linalg.norm(normal, axis=-1, keepdims=True), 1e-12) * sigma
    transform = np.stack([2.0 * axis0, 2.0 * axis1, normal], axis=-1)
    cond = np.sqrt(x * x + y * y) / ((f1 * f1).sum(-1) + (f2 * f2).sum(-1) + 1e-30)
    return transform, cond


if __name__ == "__main__":
    key = jax.random.PRNGKey(0)
    k_v, k_so3 = jax.random.split(key, 2)

    NV = 130        # canonical vertices
    NF = 200        # faces (not a multiple of 128 -> padding path exercised)
    radius_scale = 0.01
    sigma = 0.001

    # deterministic synthetic "canonical_info" + parameters (module layout (3,V)/(3,F))
    vertices = jax.random.normal(k_v, (3, NV), jnp.float32)
    idx = jnp.arange(NF)
    # Arithmetic face table: the three vertex ids of every face are distinct, so
    # no exactly-degenerate (zero-area) triangles (ill-posed in the reference too).
    faces = jnp.stack([idx % NV, (idx + 37) % NV, (idx + 71) % NV], axis=1)
    so3 = 0.1 * jax.random.normal(k_so3, (3, NF), jnp.float32)
    scale = jnp.ones((3, NF), jnp.float32) * radius_scale

    # glue: gather triangles   vertices.T[faces] -> (F, 3, 3)
    triangles = vertices.T[faces.reshape(-1)].reshape(NF, 3, 3)

    # glue: cov_local = R @ diag(scale)^2 @ R^T   (per face)
    R = so3_exp_map(so3.T)
    S2 = jax.vmap(jnp.diag)(scale.T ** 2)
    cov_local = (R @ S2 @ jnp.swapaxes(R, -1, -2)).astype(jnp.float32)

    # Pallas hot path
    run = jax.jit(functools.partial(steiner_transform_and_cov, sigma=sigma))
    transform, cov_obs, xyz_obs = run(triangles, cov_local)
    jax.block_until_ready((transform, cov_obs, xyz_obs))

    # verify against a float64 NumPy reference of the PyTorch math
    tri64 = np.asarray(triangles, np.float64)
    cov64 = np.asarray(cov_local, np.float64)
    t_ref, cond = steiner_reference_np(tri64, sigma)
    c_ref = t_ref @ cov64 @ np.transpose(t_ref, (0, 2, 1))
    cen_ref = tri64.mean(axis=1)

    t_np = np.asarray(transform, np.float64)
    c_np = np.asarray(cov_obs, np.float64)
    cen_np = np.asarray(xyz_obs, np.float64)
    assert np.isfinite(t_np).all() and np.isfinite(c_np).all() and np.isfinite(cen_np).all()

    cen_err = float(np.max(np.abs(cen_np - cen_ref)))
    assert cen_err < 1e-5, f"centroid mismatch: max abs err {cen_err}"

    # Faces whose Steiner ellipse is nearly circular hit the ill-posed
    # atan2(~0, ~0) branch (the axis pair is not a well-defined function of the
    # inputs there — true for the PyTorch reference as well), so exclude them
    # from the element-wise comparison.
    well = cond > 0.05
    assert int(well.sum()) > NF // 2
    t_err = float(np.max(np.abs(t_np - t_ref)[well]))
    c_err = float(np.max(np.abs(c_np - c_ref)[well]))
    assert t_err < 5e-4, f"transform mismatch: max abs err {t_err}"
    assert c_err < 2e-5, f"cov mismatch: max abs err {c_err}"

    # TODO(synk): AppearanceModule, LBS warp (apply_lbs/get_global_RTs), pose
    # refinement, non-rigid module, renderers, normal renderer, shadow module and
    # pytorch3d Meshes utilities depend on external sub-modules not present in
    # the reference; they are not translated here.
    print("KERNEL_OK")
</pallas_src>

<mosaic_0001>
module attributes {stable_mosaic.version = 11 : i64} {
  func.func @_steiner_cov_kernel(%arg0: i32, %arg1: memref<9x8x128xf32, #tpu.memory_space<vmem>>, %arg2: memref<9x8x128xf32, #tpu.memory_space<vmem>>, %arg3: memref<9x8x128xf32, #tpu.memory_space<vmem>>, %arg4: memref<9x8x128xf32, #tpu.memory_space<vmem>>, %arg5: memref<3x8x128xf32, #tpu.memory_space<vmem>>) attributes {dimension_semantics = [#tpu.dimension_semantics<parallel>], iteration_bounds = array<i64: 1>, scalar_prefetch = 0 : i64, scratch_operands = 0 : i64, tpu.core_type = #tpu.core_type<tc>, window_params = [{transform_indices = @transform_0, window_bounds = array<i64: 9, 8, 128>}, {transform_indices = @transform_1, window_bounds = array<i64: 9, 8, 128>}, {transform_indices = @transform_2, window_bounds = array<i64: 9, 8, 128>}, {transform_indices = @transform_3, window_bounds = array<i64: 9, 8, 128>}, {transform_indices = @transform_4, window_bounds = array<i64: 3, 8, 128>}]} {
    %c0_i32 = arith.constant 0 : i32
    %c8_i32 = arith.constant 8 : i32
    %0 = arith.muli %c0_i32, %c8_i32 : i32
    %1 = tpu.assume_multiple %0, 8 : i32
    %c0 = arith.constant 0 : index
    %2 = arith.index_cast %1 : i32 to index
    %c0_0 = arith.constant 0 : index
    %3 = vector.load %arg1[%c0, %2, %c0_0] : memref<9x8x128xf32, #tpu.memory_space<vmem>>, vector<9x8x128xf32>
    %c0_1 = arith.constant 0 : index
    %4 = arith.index_cast %1 : i32 to index
    %c0_2 = arith.constant 0 : index
    %5 = vector.load %arg2[%c0_1, %4, %c0_2] : memref<9x8x128xf32, #tpu.memory_space<vmem>>, vector<9x8x128xf32>
    %6 = vector.extract_strided_slice %3 {offsets = [0, 0, 0], sizes = [1, 8, 128], strides = [1, 1, 1]} : vector<9x8x128xf32> to vector<1x8x128xf32>
    %7 = vector.shape_cast %6 : vector<1x8x128xf32> to vector<8x128xf32>
    %8 = vector.extract_strided_slice %3 {offsets = [1, 0, 0], sizes = [1, 8, 128], strides = [1, 1, 1]} : vector<9x8x128xf32> to vector<1x8x128xf32>
    %9 = vector.shape_cast %8 : vector<1x8x128xf32> to vector<8x128xf32>
    %10 = vector.extract_strided_slice %3 {offsets = [2, 0, 0], sizes = [1, 8, 128], strides = [1, 1, 1]} : vector<9x8x128xf32> to vector<1x8x128xf32>
    %11 = vector.shape_cast %10 : vector<1x8x128xf32> to vector<8x128xf32>
    %12 = vector.extract_strided_slice %3 {offsets = [3, 0, 0], sizes = [1, 8, 128], strides = [1, 1, 1]} : vector<9x8x128xf32> to vector<1x8x128xf32>
    %13 = vector.shape_cast %12 : vector<1x8x128xf32> to vector<8x128xf32>
    %14 = vector.extract_strided_slice %3 {offsets = [4, 0, 0], sizes = [1, 8, 128], strides = [1, 1, 1]} : vector<9x8x128xf32> to vector<1x8x128xf32>
    %15 = vector.shape_cast %14 : vector<1x8x128xf32> to vector<8x128xf32>
    %16 = vector.extract_strided_slice %3 {offsets = [5, 0, 0], sizes = [1, 8, 128], strides = [1, 1, 1]} : vector<9x8x128xf32> to vector<1x8x128xf32>
    %17 = vector.shape_cast %16 : vector<1x8x128xf32> to vector<8x128xf32>
    %18 = vector.extract_strided_slice %3 {offsets = [6, 0, 0], sizes = [1, 8, 128], strides = [1, 1, 1]} : vector<9x8x128xf32> to vector<1x8x128xf32>
    %19 = vector.shape_cast %18 : vector<1x8x128xf32> to vector<8x128xf32>
    %20 = vector.extract_strided_slice %3 {offsets = [7, 0, 0], sizes = [1, 8, 128], strides = [1, 1, 1]} : vector<9x8x128xf32> to vector<1x8x128xf32>
    %21 = vector.shape_cast %20 : vector<1x8x128xf32> to vector<8x128xf32>
    %22 = vector.extract_strided_slice %3 {offsets = [8, 0, 0], sizes = [1, 8, 128], strides = [1, 1, 1]} : vector<9x8x128xf32> to vector<1x8x128xf32>
    %23 = vector.shape_cast %22 : vector<1x8x128xf32> to vector<8x128xf32>
    %24 = arith.addf %7, %13 : vector<8x128xf32>
    %25 = arith.addf %24, %19 : vector<8x128xf32>
    %cst = arith.constant 0.333333343 : f32
    %26 = vector.broadcast %cst : f32 to vector<8x128xf32>
    %27 = arith.mulf %25, %26 : vector<8x128xf32>
    %28 = arith.addf %9, %15 : vector<8x128xf32>
    %29 = arith.addf %28, %21 : vector<8x128xf32>
    %cst_3 = arith.constant 0.333333343 : f32
    %30 = vector.broadcast %cst_3 : f32 to vector<8x128xf32>
    %31 = arith.mulf %29, %30 : vector<8x128xf32>
    %32 = arith.addf %11, %17 : vector<8x128xf32>
    %33 = arith.addf %32, %23 : vector<8x128xf32>
    %cst_4 = arith.constant 0.333333343 : f32
    %34 = vector.broadcast %cst_4 : f32 to vector<8x128xf32>
    %35 = arith.mulf %33, %34 : vector<8x128xf32>
    %36 = arith.subf %19, %27 : vector<8x128xf32>
    %cst_5 = arith.constant 5.000000e-01 : f32
    %37 = vector.broadcast %cst_5 : f32 to vector<8x128xf32>
    %38 = arith.mulf %37, %36 : vector<8x128xf32>
    %39 = arith.subf %21, %31 : vector<8x128xf32>
    %cst_6 = arith.constant 5.000000e-01 : f32
    %40 = vector.broadcast %cst_6 : f32 to vector<8x128xf32>
    %41 = arith.mulf %40, %39 : vector<8x128xf32>
    %42 = arith.subf %23, %35 : vector<8x128xf32>
    %cst_7 = arith.constant 5.000000e-01 : f32
    %43 = vector.broadcast %cst_7 : f32 to vector<8x128xf32>
    %44 = arith.mulf %43, %42 : vector<8x128xf32>
    %45 = arith.subf %13, %7 : vector<8x128xf32>
    %cst_8 = arith.constant 0.288675129 : f32
    %46 = vector.broadcast %cst_8 : f32 to vector<8x128xf32>
    %47 = arith.mulf %46, %45 : vector<8x128xf32>
    %48 = arith.subf %15, %9 : vector<8x128xf32>
    %cst_9 = arith.constant 0.288675129 : f32
    %49 = vector.broadcast %cst_9 : f32 to vector<8x128xf32>
    %50 = arith.mulf %49, %48 : vector<8x128xf32>
    %51 = arith.subf %17, %11 : vector<8x128xf32>
    %cst_10 = arith.constant 0.288675129 : f32
    %52 = vector.broadcast %cst_10 : f32 to vector<8x128xf32>
    %53 = arith.mulf %52, %51 : vector<8x128xf32>
    %54 = vector.shape_cast %27 : vector<8x128xf32> to vector<1x8x128xf32>
    %c0_11 = arith.constant 0 : index
    %55 = arith.index_cast %1 : i32 to index
    %c0_12 = arith.constant 0 : index
    %56 = vector.load %arg5[%c0_11, %55, %c0_12] : memref<3x8x128xf32, #tpu.memory_space<vmem>>, vector<1x8x128xf32>
    tpu.vector_store %arg5[%c0_11, %55, %c0_12], %54 {strides = array<i32>} : memref<3x8x128xf32, #tpu.memory_space<vmem>>, vector<1x8x128xf32>,
    %57 = vector.shape_cast %31 : vector<8x128xf32> to vector<1x8x128xf32>
    %c1 = arith.constant 1 : index
    %58 = arith.index_cast %1 : i32 to index
    %c0_13 = arith.constant 0 : index
    %59 = vector.load %arg5[%c1, %58, %c0_13] : memref<3x8x128xf32, #tpu.memory_space<vmem>>, vector<1x8x128xf32>
    tpu.vector_store %arg5[%c1, %58, %c0_13], %57 {strides = array<i32>} : memref<3x8x128xf32, #tpu.memory_space<vmem>>, vector<1x8x128xf32>,
    %60 = vector.shape_cast %35 : vector<8x128xf32> to vector<1x8x128xf32>
    %c2 = arith.constant 2 : index
    %61 = arith.index_cast %1 : i32 to index
    %c0_14 = arith.constant 0 : index
    %62 = vector.load %arg5[%c2, %61, %c0_14] : memref<3x8x128xf32, #tpu.memory_space<vmem>>, vector<1x8x128xf32>
    tpu.vector_store %arg5[%c2, %61, %c0_14], %60 {strides = array<i32>} : memref<3x8x128xf32, #tpu.memory_space<vmem>>, vector<1x8x128xf32>,
    %63 = arith.mulf %38, %47 : vector<8x128xf32>
    %64 = arith.mulf %41, %50 : vector<8x128xf32>
    %65 = arith.addf %63, %64 : vector<8x128xf32>
    %66 = arith.mulf %44, %53 : vector<8x128xf32>
    %67 = arith.addf %65, %66 : vector<8x128xf32>
    %68 = arith.mulf %38, %38 : vector<8x128xf32>
    %69 = arith.mulf %41, %41 : vector<8x128xf32>
    %70 = arith.addf %68, %69 : vector<8x128xf32>
    %71 = arith.mulf %44, %44 : vector<8x128xf32>
    %72 = arith.addf %70, %71 : vector<8x128xf32>
    %73 = arith.mulf %47, %47 : vector<8x128xf32>
    %74 = arith.mulf %50, %50 : vector<8x128xf32>
    %75 = arith.addf %73, %74 : vector<8x128xf32>
    %76 = arith.mulf %53, %53 : vector<8x128xf32>
    %77 = arith.addf %75, %76 : vector<8x128xf32>
    %78 = arith.addf %67, %67 : vector<8x128xf32>
    %79 = arith.subf %72, %77 : vector<8x128xf32>
    %80 = arith.mulf %79, %79 : vector<8x128xf32>
    %81 = arith.mulf %78, %78 : vector<8x128xf32>
    %82 = arith.addf %80, %81 : vector<8x128xf32>
    %cst_15 = arith.constant 1.000000e-30 : f32
    %83 = vector.broadcast %cst_15 : f32 to vector<8x128xf32>
    %84 = arith.maximumf %82, %83 : vector<8x128xf32>
    %85 = math.rsqrt %84 : vector<8x128xf32>
    %cst_16 = arith.constant 1.000000e-30 : f32
    %86 = vector.broadcast %cst_16 : f32 to vector<8x128xf32>
    %87 = arith.cmpf ogt, %82, %86 : vector<8x128xf32>
    %88 = arith.mulf %79, %85 : vector<8x128xf32>
    %cst_17 = arith.constant 1.000000e+00 : f32
    %89 = vector.broadcast %cst_17 : f32 to vector<8x128xf32>
    %90 = arith.select %87, %88, %89 : vector<8x128xi1>, vector<8x128xf32>
    %91 = arith.mulf %78, %85 : vector<8x128xf32>
    %cst_18 = arith.constant 0.000000e+00 : f32
    %92 = vector.broadcast %cst_18 : f32 to vector<8x128xf32>
    %93 = arith.select %87, %91, %92 : vector<8x128xi1>, vector<8x128xf32>
    %cst_19 = arith.constant 1.000000e+00 : f32
    %94 = vector.broadcast %cst_19 : f32 to vector<8x128xf32>
    %95 = arith.addf %94, %90 : vector<8x128xf32>
    %cst_20 = arith.constant 5.000000e-01 : f32
    %96 = vector.broadcast %cst_20 : f32 to vector<8x128xf32>
    %97 = arith.mulf %96, %95 : vector<8x128xf32>
    %cst_21 = arith.constant 0.000000e+00 : f32
    %98 = vector.broadcast %cst_21 : f32 to vector<8x128xf32>
    %99 = arith.maximumf %97, %98 : vector<8x128xf32>
    %100 = math.sqrt %99 : vector<8x128xf32>
    %cst_22 = arith.constant 1.000000e+00 : f32
    %101 = vector.broadcast %cst_22 : f32 to vector<8x128xf32>
    %102 = arith.subf %101, %90 : vector<8x128xf32>
    %cst_23 = arith.constant 5.000000e-01 : f32
    %103 = vector.broadcast %cst_23 : f32 to vector<8x128xf32>
    %104 = arith.mulf %103, %102 : vector<8x128xf32>
    %cst_24 = arith.constant 0.000000e+00 : f32
    %105 = vector.broadcast %cst_24 : f32 to vector<8x128xf32>
    %106 = arith.maximumf %104, %105 : vector<8x128xf32>
    %107 = math.sqrt %106 : vector<8x128xf32>
    %cst_25 = arith.constant 0.000000e+00 : f32
    %108 = vector.broadcast %cst_25 : f32 to vector<8x128xf32>
    %109 = arith.cmpf oge, %90, %108 : vector<8x128xf32>
    %110 = arith.select %109, %100, %107 : vector<8x128xi1>, vector<8x128xf32>
    %cst_26 = arith.constant 9.99999997E-7 : f32
    %111 = vector.broadcast %cst_26 : f32 to vector<8x128xf32>
    %112 = arith.maximumf %110, %111 : vector<8x128xf32>
    %cst_27 = arith.constant 5.000000e-01 : f32
    %113 = vector.broadcast %cst_27 : f32 to vector<8x128xf32>
    %114 = arith.divf %113, %112 : vector<8x128xf32>
    %cst_28 = arith.constant 0.000000e+00 : f32
    %115 = vector.broadcast %cst_28 : f32 to vector<8x128xf32>
    %116 = arith.cmpf oge, %93, %115 : vector<8x128xf32>
    %cst_29 = arith.constant 1.000000e+00 : f32
    %cst_30 = arith.constant -1.000000e+00 : f32
    %117 = vector.broadcast %cst_29 : f32 to vector<8x128xf32>
    %118 = vector.broadcast %cst_30 : f32 to vector<8x128xf32>
    %119 = arith.select %116, %117, %118 : vector<8x128xi1>, vector<8x128xf32>
    %120 = math.absf %93 : vector<8x128xf32>
    %121 = arith.mulf %120, %114 : vector<8x128xf32>
    %122 = arith.select %109, %100, %121 : vector<8x128xi1>, vector<8x128xf32>
    %123 = arith.mulf %93, %114 : vector<8x128xf32>
    %124 = arith.mulf %119, %107 : vector<8x128xf32>
    %125 = arith.select %109, %123, %124 : vector<8x128xi1>, vector<8x128xf32>
    %126 = arith.mulf %38, %122 : vector<8x128xf32>
    %127 = arith.mulf %47, %125 : vector<8x128xf32>
    %128 = arith.addf %126, %127 : vector<8x128xf32>
    %129 = arith.mulf %41, %122 : vector<8x128xf32>
    %130 = arith.mulf %50, %125 : vector<8x128xf32>
    %131 = arith.addf %129, %130 : vector<8x128xf32>
    %132 = arith.mulf %44, %122 : vector<8x128xf32>
    %133 = arith.mulf %53, %125 : vector<8x128xf32>
    %134 = arith.addf %132, %133 : vector<8x128xf32>
    %135 = arith.mulf %47, %122 : vector<8x128xf32>
    %136 = arith.mulf %38, %125 : vector<8x128xf32>
    %137 = arith.subf %135, %136 : vector<8x128xf32>
    %138 = arith.mulf %50, %122 : vector<8x128xf32>
    %139 = arith.mulf %41, %125 : vector<8x128xf32>
    %140 = arith.subf %138, %139 : vector<8x128xf32>
    %141 = arith.mulf %53, %122 : vector<8x128xf32>
    %142 = arith.mulf %44, %125 : vector<8x128xf32>
    %143 = arith.subf %141, %142 : vector<8x128xf32>
    %144 = arith.mulf %131, %143 : vector<8x128xf32>
    %145 = arith.mulf %134, %140 : vector<8x128xf32>
    %146 = arith.subf %144, %145 : vector<8x128xf32>
    %147 = arith.mulf %134, %137 : vector<8x128xf32>
    %148 = arith.mulf %128, %143 : vector<8x128xf32>
    %149 = arith.subf %147, %148 : vector<8x128xf32>
    %150 = arith.mulf %128, %140 : vector<8x128xf32>
    %151 = arith.mulf %131, %137 : vector<8x128xf32>
    %152 = arith.subf %150, %151 : vector<8x128xf32>
    %153 = arith.mulf %146, %146 : vector<8x128xf32>
    %154 = arith.mulf %149, %149 : vector<8x128xf32>
    %155 = arith.addf %153, %154 : vector<8x128xf32>
    %156 = arith.mulf %152, %152 : vector<8x128xf32>
    %157 = arith.addf %155, %156 : vector<8x128xf32>
    %cst_31 = arith.constant 1.000000e-24 : f32
    %158 = vector.broadcast %cst_31 : f32 to vector<8x128xf32>
    %159 = arith.maximumf %157, %158 : vector<8x128xf32>
    %160 = math.rsqrt %159 : vector<8x128xf32>
    %cst_32 = arith.constant 1.000000e-03 : f32
    %161 = vector.broadcast %cst_32 : f32 to vector<8x128xf32>
    %162 = arith.mulf %161, %160 : vector<8x128xf32>
    %163 = arith.mulf %146, %162 : vector<8x128xf32>
    %164 = arith.mulf %149, %162 : vector<8x128xf32>
    %165 = arith.mulf %152, %162 : vector<8x128xf32>
    %166 = arith.addf %128, %128 : vector<8x128xf32>
    %167 = arith.addf %137, %137 : vector<8x128xf32>
    %168 = arith.addf %131, %131 : vector<8x128xf32>
    %169 = arith.addf %140, %140 : vector<8x128xf32>
    %170 = arith.addf %134, %134 : vector<8x128xf32>
    %171 = arith.addf %143, %143 : vector<8x128xf32>
    %172 = vector.shape_cast %166 : vector<8x128xf32> to vector<1x8x128xf32>
    %c0_33 = arith.constant 0 : index
    %173 = arith.index_cast %1 : i32 to index
    %c0_34 = arith.constant 0 : index
    %174 = vector.load %arg3[%c0_33, %173, %c0_34] : memref<9x8x128xf32, #tpu.memory_space<vmem>>, vector<1x8x128xf32>
    tpu.vector_store %arg3[%c0_33, %173, %c0_34], %172 {strides = array<i32>} : memref<9x8x128xf32, #tpu.memory_space<vmem>>, vector<1x8x128xf32>,
    %175 = vector.shape_cast %167 : vector<8x128xf32> to vector<1x8x128xf32>
    %c1_35 = arith.constant 1 : index
    %176 = arith.index_cast %1 : i32 to index
    %c0_36 = arith.constant 0 : index
    %177 = vector.load %arg3[%c1_35, %176, %c0_36] : memref<9x8x128xf32, #tpu.memory_space<vmem>>, vector<1x8x128xf32>
    tpu.vector_store %arg3[%c1_35, %176, %c0_36], %175 {strides = array<i32>} : memref<9x8x128xf32, #tpu.memory_space<vmem>>, vector<1x8x128xf32>,
    %178 = vector.shape_cast %163 : vector<8x128xf32> to vector<1x8x128xf32>
    %c2_37 = arith.constant 2 : index
    %179 = arith.index_cast %1 : i32 to index
    %c0_38 = arith.constant 0 : index
    %180 = vector.load %arg3[%c2_37, %179, %c0_38] : memref<9x8x128xf32, #tpu.memory_space<vmem>>, vector<1x8x128xf32>
    tpu.vector_store %arg3[%c2_37, %179, %c0_38], %178 {strides = array<i32>} : memref<9x8x128xf32, #tpu.memory_space<vmem>>, vector<1x8x128xf32>,
    %181 = vector.shape_cast %168 : vector<8x128xf32> to vector<1x8x128xf32>
    %c3 = arith.constant 3 : index
    %182 = arith.index_cast %1 : i32 to index
    %c0_39 = arith.constant 0 : index
    %183 = vector.load %arg3[%c3, %182, %c0_39] : memref<9x8x128xf32, #tpu.memory_space<vmem>>, vector<1x8x128xf32>
    tpu.vector_store %arg3[%c3, %182, %c0_39], %181 {strides = array<i32>} : memref<9x8x128xf32, #tpu.memory_space<vmem>>, vector<1x8x128xf32>,
    %184 = vector.shape_cast %169 : vector<8x128xf32> to vector<1x8x128xf32>
    %c4 = arith.constant 4 : index
    %185 = arith.index_cast %1 : i32 to index
    %c0_40 = arith.constant 0 : index
    %186 = vector.load %arg3[%c4, %185, %c0_40] : memref<9x8x128xf32, #tpu.memory_space<vmem>>, vector<1x8x128xf32>
    tpu.vector_store %arg3[%c4, %185, %c0_40], %184 {strides = array<i32>} : memref<9x8x128xf32, #tpu.memory_space<vmem>>, vector<1x8x128xf32>,
    %187 = vector.shape_cast %164 : vector<8x128xf32> to vector<1x8x128xf32>
    %c5 = arith.constant 5 : index
    %188 = arith.index_cast %1 : i32 to index
    %c0_41 = arith.constant 0 : index
    %189 = vector.load %arg3[%c5, %188, %c0_41] : memref<9x8x128xf32, #tpu.memory_space<vmem>>, vector<1x8x128xf32>
    tpu.vector_store %arg3[%c5, %188, %c0_41], %187 {strides = array<i32>} : memref<9x8x128xf32, #tpu.memory_space<vmem>>, vector<1x8x128xf32>,
    %190 = vector.shape_cast %170 : vector<8x128xf32> to vector<1x8x128xf32>
    %c6 = arith.constant 6 : index
    %191 = arith.index_cast %1 : i32 to index
    %c0_42 = arith.constant 0 : index
    %192 = vector.load %arg3[%c6, %191, %c0_42] : memref<9x8x128xf32, #tpu.memory_space<vmem>>, vector<1x8x128xf32>
    tpu.vector_store %arg3[%c6, %191, %c0_42], %190 {strides = array<i32>} : memref<9x8x128xf32, #tpu.memory_space<vmem>>, vector<1x8x128xf32>,
    %193 = vector.shape_cast %171 : vector<8x128xf32> to vector<1x8x128xf32>
    %c7 = arith.constant 7 : index
    %194 = arith.index_cast %1 : i32 to index
    %c0_43 = arith.constant 0 : index
    %195 = vector.load %arg3[%c7, %194, %c0_43] : memref<9x8x128xf32, #tpu.memory_space<vmem>>, vector<1x8x128xf32>
    tpu.vector_store %arg3[%c7, %194, %c0_43], %193 {strides = array<i32>} : memref<9x8x128xf32, #tpu.memory_space<vmem>>, vector<1x8x128xf32>,
    %196 = vector.shape_cast %165 : vector<8x128xf32> to vector<1x8x128xf32>
    %c8 = arith.constant 8 : index
    %197 = arith.index_cast %1 : i32 to index
    %c0_44 = arith.constant 0 : index
    %198 = vector.load %arg3[%c8, %197, %c0_44] : memref<9x8x128xf32, #tpu.memory_space<vmem>>, vector<1x8x128xf32>
    tpu.vector_store %arg3[%c8, %197, %c0_44], %196 {strides = array<i32>} : memref<9x8x128xf32, #tpu.memory_space<vmem>>, vector<1x8x128xf32>,
    %199 = vector.extract_strided_slice %5 {offsets = [0, 0, 0], sizes = [1, 8, 128], strides = [1, 1, 1]} : vector<9x8x128xf32> to vector<1x8x128xf32>
    %200 = vector.shape_cast %199 : vector<1x8x128xf32> to vector<8x128xf32>
    %201 = vector.extract_strided_slice %5 {offsets = [1, 0, 0], sizes = [1, 8, 128], strides = [1, 1, 1]} : vector<9x8x128xf32> to vector<1x8x128xf32>
    %202 = vector.shape_cast %201 : vector<1x8x128xf32> to vector<8x128xf32>
    %203 = vector.extract_strided_slice %5 {offsets = [2, 0, 0], sizes = [1, 8, 128], strides = [1, 1, 1]} : vector<9x8x128xf32> to vector<1x8x128xf32>
    %204 = vector.shape_cast %203 : vector<1x8x128xf32> to vector<8x128xf32>
    %205 = vector.extract_strided_slice %5 {offsets = [3, 0, 0], sizes = [1, 8, 128], strides = [1, 1, 1]} : vector<9x8x128xf32> to vector<1x8x128xf32>
    %206 = vector.shape_cast %205 : vector<1x8x128xf32> to vector<8x128xf32>
    %207 = vector.extract_strided_slice %5 {offsets = [4, 0, 0], sizes = [1, 8, 128], strides = [1, 1, 1]} : vector<9x8x128xf32> to vector<1x8x128xf32>
    %208 = vector.shape_cast %207 : vector<1x8x128xf32> to vector<8x128xf32>
    %209 = vector.extract_strided_slice %5 {offsets = [5, 0, 0], sizes = [1, 8, 128], strides = [1, 1, 1]} : vector<9x8x128xf32> to vector<1x8x128xf32>
    %210 = vector.shape_cast %209 : vector<1x8x128xf32> to vector<8x128xf32>
    %211 = vector.extract_strided_slice %5 {offsets = [6, 0, 0], sizes = [1, 8, 128], strides = [1, 1, 1]} : vector<9x8x128xf32> to vector<1x8x128xf32>
    %212 = vector.shape_cast %211 : vector<1x8x128xf32> to vector<8x128xf32>
    %213 = vector.extract_strided_slice %5 {offsets = [7, 0, 0], sizes = [1, 8, 128], strides = [1, 1, 1]} : vector<9x8x128xf32> to vector<1x8x128xf32>
    %214 = vector.shape_cast %213 : vector<1x8x128xf32> to vector<8x128xf32>
    %215 = vector.extract_strided_slice %5 {offsets = [8, 0, 0], sizes = [1, 8, 128], strides = [1, 1, 1]} : vector<9x8x128xf32> to vector<1x8x128xf32>
    %216 = vector.shape_cast %215 : vector<1x8x128xf32> to vector<8x128xf32>
    %217 = arith.mulf %166, %200 : vector<8x128xf32>
    %218 = arith.mulf %167, %206 : vector<8x128xf32>
    %219 = arith.addf %217, %218 : vector<8x128xf32>
    %220 = arith.mulf %163, %212 : vector<8x128xf32>
    %221 = arith.addf %219, %220 : vector<8x128xf32>
    %222 = arith.mulf %166, %202 : vector<8x128xf32>
    %223 = arith.mulf %167, %208 : vector<8x128xf32>
    %224 = arith.addf %222, %223 : vector<8x128xf32>
    %225 = arith.mulf %163, %214 : vector<8x128xf32>
    %226 = arith.addf %224, %225 : vector<8x128xf32>
    %227 = arith.mulf %166, %204 : vector<8x128xf32>
    %228 = arith.mulf %167, %210 : vector<8x128xf32>
    %229 = arith.addf %227, %228 : vector<8x128xf32>
    %230 = arith.mulf %163, %216 : vector<8x128xf32>
    %231 = arith.addf %229, %230 : vector<8x128xf32>
    %232 = arith.mulf %168, %200 : vector<8x128xf32>
    %233 = arith.mulf %169, %206 : vector<8x128xf32>
    %234 = arith.addf %232, %233 : vector<8x128xf32>
    %235 = arith.mulf %164, %212 : vector<8x128xf32>
    %236 = arith.addf %234, %235 : vector<8x128xf32>
    %237 = arith.mulf %168, %202 : vector<8x128xf32>
    %238 = arith.mulf %169, %208 : vector<8x128xf32>
    %239 = arith.addf %237, %238 : vector<8x128xf32>
    %240 = arith.mulf %164, %214 : vector<8x128xf32>
    %241 = arith.addf %239, %240 : vector<8x128xf32>
    %242 = arith.mulf %168, %204 : vector<8x128xf32>
    %243 = arith.mulf %169, %210 : vector<8x128xf32>
    %244 = arith.addf %242, %243 : vector<8x128xf32>
    %245 = arith.mulf %164, %216 : vector<8x128xf32>
    %246 = arith.addf %244, %245 : vector<8x128xf32>
    %247 = arith.mulf %170, %200 : vector<8x128xf32>
    %248 = arith.mulf %171, %206 : vector<8x128xf32>
    %249 = arith.addf %247, %248 : vector<8x128xf32>
    %250 = arith.mulf %165, %212 : vector<8x128xf32>
    %251 = arith.addf %249, %250 : vector<8x128xf32>
    %252 = arith.mulf %170, %202 : vector<8x128xf32>
    %253 = arith.mulf %171, %208 : vector<8x128xf32>
    %254 = arith.addf %252, %253 : vector<8x128xf32>
    %255 = arith.mulf %165, %214 : vector<8x128xf32>
    %256 = arith.addf %254, %255 : vector<8x128xf32>
    %257 = arith.mulf %170, %204 : vector<8x128xf32>
    %258 = arith.mulf %171, %210 : vector<8x128xf32>
    %259 = arith.addf %257, %258 : vector<8x128xf32>
    %260 = arith.mulf %165, %216 : vector<8x128xf32>
    %261 = arith.addf %259, %260 : vector<8x128xf32>
    %262 = arith.mulf %221, %166 : vector<8x128xf32>
    %263 = arith.mulf %226, %167 : vector<8x128xf32>
    %264 = arith.addf %262, %263 : vector<8x128xf32>
    %265 = arith.mulf %231, %163 : vector<8x128xf32>
    %266 = arith.addf %264, %265 : vector<8x128xf32>
    %267 = vector.shape_cast %266 : vector<8x128xf32> to vector<1x8x128xf32>
    %c0_45 = arith.constant 0 : index
    %268 = arith.index_cast %1 : i32 to index
    %c0_46 = arith.constant 0 : index
    %269 = vector.load %arg4[%c0_45, %268, %c0_46] : memref<9x8x128xf32, #tpu.memory_space<vmem>>, vector<1x8x128xf32>
    tpu.vector_store %arg4[%c0_45, %268, %c0_46], %267 {strides = array<i32>} : memref<9x8x128xf32, #tpu.memory_space<vmem>>, vector<1x8x128xf32>,
    %270 = arith.mulf %221, %168 : vector<8x128xf32>
    %271 = arith.mulf %226, %169 : vector<8x128xf32>
    %272 = arith.addf %270, %271 : vector<8x128xf32>
    %273 = arith.mulf %231, %164 : vector<8x128xf32>
    %274 = arith.addf %272, %273 : vector<8x128xf32>
    %275 = vector.shape_cast %274 : vector<8x128xf32> to vector<1x8x128xf32>
    %c1_47 = arith.constant 1 : index
    %276 = arith.index_cast %1 : i32 to index
    %c0_48 = arith.constant 0 : index
    %277 = vector.load %arg4[%c1_47, %276, %c0_48] : memref<9x8x128xf32, #tpu.memory_space<vmem>>, vector<1x8x128xf32>
    tpu.vector_store %arg4[%c1_47, %276, %c0_48], %275 {strides = array<i32>} : memref<9x8x128xf32, #tpu.memory_space<vmem>>, vector<1x8x128xf32>,
    %278 = arith.mulf %221, %170 : vector<8x128xf32>
    %279 = arith.mulf %226, %171 : vector<8x128xf32>
    %280 = arith.addf %278, %279 : vector<8x128xf32>
    %281 = arith.mulf %231, %165 : vector<8x128xf32>
    %282 = arith.addf %280, %281 : vector<8x128xf32>
    %283 = vector.shape_cast %282 : vector<8x128xf32> to vector<1x8x128xf32>
    %c2_49 = arith.constant 2 : index
    %284 = arith.index_cast %1 : i32 to index
    %c0_50 = arith.constant 0 : index
    %285 = vector.load %arg4[%c2_49, %284, %c0_50] : memref<9x8x128xf32, #tpu.memory_space<vmem>>, vector<1x8x128xf32>
    tpu.vector_store %arg4[%c2_49, %284, %c0_50], %283 {strides = array<i32>} : memref<9x8x128xf32, #tpu.memory_space<vmem>>, vector<1x8x128xf32>,
    %286 = arith.mulf %236, %166 : vector<8x128xf32>
    %287 = arith.mulf %241, %167 : vector<8x128xf32>
    %288 = arith.addf %286, %287 : vector<8x128xf32>
    %289 = arith.mulf %246, %163 : vector<8x128xf32>
    %290 = arith.addf %288, %289 : vector<8x128xf32>
    %291 = vector.shape_cast %290 : vector<8x128xf32> to vector<1x8x128xf32>
    %c3_51 = arith.constant 3 : index
    %292 = arith.index_cast %1 : i32 to index
    %c0_52 = arith.constant 0 : index
    %293 = vector.load %arg4[%c3_51, %292, %c0_52] : memref<9x8x128xf32, #tpu.memory_space<vmem>>, vector<1x8x128xf32>
    tpu.vector_store %arg4[%c3_51, %292, %c0_52], %291 {strides = array<i32>} : memref<9x8x128xf32, #tpu.memory_space<vmem>>, vector<1x8x128xf32>,
    %294 = arith.mulf %236, %168 : vector<8x128xf32>
    %295 = arith.mulf %241, %169 : vector<8x128xf32>
    %296 = arith.addf %294, %295 : vector<8x128xf32>
    %297 = arith.mulf %246, %164 : vector<8x128xf32>
    %298 = arith.addf %296, %297 : vector<8x128xf32>
    %299 = vector.shape_cast %298 : vector<8x128xf32> to vector<1x8x128xf32>
    %c4_53 = arith.constant 4 : index
    %300 = arith.index_cast %1 : i32 to index
    %c0_54 = arith.constant 0 : index
    %301 = vector.load %arg4[%c4_53, %300, %c0_54] : memref<9x8x128xf32, #tpu.memory_space<vmem>>, vector<1x8x128xf32>
    tpu.vector_store %arg4[%c4_53, %300, %c0_54], %299 {strides = array<i32>} : memref<9x8x128xf32, #tpu.memory_space<vmem>>, vector<1x8x128xf32>,
    %302 = arith.mulf %236, %170 : vector<8x128xf32>
    %303 = arith.mulf %241, %171 : vector<8x128xf32>
    %304 = arith.addf %302, %303 : vector<8x128xf32>
    %305 = arith.mulf %246, %165 : vector<8x128xf32>
    %306 = arith.addf %304, %305 : vector<8x128xf32>
    %307 = vector.shape_cast %306 : vector<8x128xf32> to vector<1x8x128xf32>
    %c5_55 = arith.constant 5 : index
    %308 = arith.index_cast %1 : i32 to index
    %c0_56 = arith.constant 0 : index
    %309 = vector.load %arg4[%c5_55, %308, %c0_56] : memref<9x8x128xf32, #tpu.memory_space<vmem>>, vector<1x8x128xf32>
    tpu.vector_store %arg4[%c5_55, %308, %c0_56], %307 {strides = array<i32>} : memref<9x8x128xf32, #tpu.memory_space<vmem>>, vector<1x8x128xf32>,
    %310 = arith.mulf %251, %166 : vector<8x128xf32>
    %311 = arith.mulf %256, %167 : vector<8x128xf32>
    %312 = arith.addf %310, %311 : vector<8x128xf32>
    %313 = arith.mulf %261, %163 : vector<8x128xf32>
    %314 = arith.addf %312, %313 : vector<8x128xf32>
    %315 = vector.shape_cast %314 : vector<8x128xf32> to vector<1x8x128xf32>
    %c6_57 = arith.constant 6 : index
    %316 = arith.index_cast %1 : i32 to index
    %c0_58 = arith.constant 0 : index
    %317 = vector.load %arg4[%c6_57, %316, %c0_58] : memref<9x8x128xf32, #tpu.memory_space<vmem>>, vector<1x8x128xf32>
    tpu.vector_store %arg4[%c6_57, %316, %c0_58], %315 {strides = array<i32>} : memref<9x8x128xf32, #tpu.memory_space<vmem>>, vector<1x8x128xf32>,
    %318 = arith.mulf %251, %168 : vector<8x128xf32>
    %319 = arith.mulf %256, %169 : vector<8x128xf32>
    %320 = arith.addf %318, %319 : vector<8x128xf32>
    %321 = arith.mulf %261, %164 : vector<8x128xf32>
    %322 = arith.addf %320, %321 : vector<8x128xf32>
    %323 = vector.shape_cast %322 : vector<8x128xf32> to vector<1x8x128xf32>
    %c7_59 = arith.constant 7 : index
    %324 = arith.index_cast %1 : i32 to index
    %c0_60 = arith.constant 0 : index
    %325 = vector.load %arg4[%c7_59, %324, %c0_60] : memref<9x8x128xf32, #tpu.memory_space<vmem>>, vector<1x8x128xf32>
    tpu.vector_store %arg4[%c7_59, %324, %c0_60], %323 {strides = array<i32>} : memref<9x8x128xf32, #tpu.memory_space<vmem>>, vector<1x8x128xf32>,
    %326 = arith.mulf %251, %170 : vector<8x128xf32>
    %327 = arith.mulf %256, %171 : vector<8x128xf32>
    %328 = arith.addf %326, %327 : vector<8x128xf32>
    %329 = arith.mulf %261, %165 : vector<8x128xf32>
    %330 = arith.addf %328, %329 : vector<8x128xf32>
    %331 = vector.shape_cast %330 : vector<8x128xf32> to vector<1x8x128xf32>
    %c8_61 = arith.constant 8 : index
    %332 = arith.index_cast %1 : i32 to index
    %c0_62 = arith.constant 0 : index
    %333 = vector.load %arg4[%c8_61, %332, %c0_62] : memref<9x8x128xf32, #tpu.memory_space<vmem>>, vector<1x8x128xf32>
    tpu.vector_store %arg4[%c8_61, %332, %c0_62], %331 {strides = array<i32>} : memref<9x8x128xf32, #tpu.memory_space<vmem>>, vector<1x8x128xf32>,
    %c1_i32 = arith.constant 1 : i32
    return
  }
  func.func @transform_0(%arg0: i32) -> (i32, i32, i32) {
    %c0_i32 = arith.constant 0 : i32
    %c0_i32_0 = arith.constant 0 : i32
    %c0_i32_1 = arith.constant 0 : i32
    return %c0_i32, %arg0, %c0_i32_0 : i32, i32, i32
  }
  func.func @transform_1(%arg0: i32) -> (i32, i32, i32) {
    %c0_i32 = arith.constant 0 : i32
    %c0_i32_0 = arith.constant 0 : i32
    %c0_i32_1 = arith.constant 0 : i32
    return %c0_i32, %arg0, %c0_i32_0 : i32, i32, i32
  }
  func.func @transform_2(%arg0: i32) -> (i32, i32, i32) {
    %c0_i32 = arith.constant 0 : i32
    %c0_i32_0 = arith.constant 0 : i32
    %c0_i32_1 = arith.constant 0 : i32
    return %c0_i32, %arg0, %c0_i32_0 : i32, i32, i32
  }
  func.func @transform_3(%arg0: i32) -> (i32, i32, i32) {
    %c0_i32 = arith.constant 0 : i32
    %c0_i32_0 = arith.constant 0 : i32
    %c0_i32_1 = arith.constant 0 : i32
    return %c0_i32, %arg0, %c0_i32_0 : i32, i32, i32
  }
  func.func @transform_4(%arg0: i32) -> (i32, i32, i32) {
    %c0_i32 = arith.constant 0 : i32
    %c0_i32_0 = arith.constant 0 : i32
    %c0_i32_1 = arith.constant 0 : i32
    return %c0_i32, %arg0, %c0_i32_0 : i32, i32, i32
  }
}

</mosaic_0001>

<bundles_post_ra>
// kernel: steiner_transform_and_cov.1
= control target key start
LH: loop header
LB: loop body
LE: loop exit
PB: predicated region body
PF: predicated region fallthrough
CT: control target
= control target key end

     0   :  { %s624_s0 = inlined_call_operand.vmem [shape: f32[9,8,128], index: 0, kind: input, shape index: {}]   ;;  %s625_s4 = inlined_call_operand.vmem [shape: f32[3,8,128], index: 4, kind: output, shape index: {2}]   ;;  %s626_s2 = inlined_call_operand.vmem [shape: f32[9,8,128], index: 2, kind: output, shape index: {0}]   ;;  %s627_s1 = inlined_call_operand.vmem [shape: f32[9,8,128], index: 1, kind: input, shape index: {}]   ;;  %s628_s3 = inlined_call_operand.vmem [shape: f32[9,8,128], index: 3, kind: output, shape index: {1}]  }
   0x1   :  { %v14_v0 = vld [vmem:[%s624_s0] sm:$0xff]  ;;  %v17_v1 = vld [vmem:[%s624_s0 + $0x18] sm:$0xff]  ;;  %v20_v2 = vld [vmem:[%s624_s0 + $0x30] sm:$0xff] }
   0x2   :  { %v32_v3 = vadd.f32 %v17_v1, %v14_v0  ;;  %v47_v4 = vsub.f32 %v17_v1, %v14_v0  ;;  %v15_v5 = vld [vmem:[%s624_s0 + $0x8] sm:$0xff]  ;;  %v18_v6 = vld [vmem:[%s624_s0 + $0x20] sm:$0xff]  ;;  %v21_v7 = vld [vmem:[%s624_s0 + $0x38] sm:$0xff] }
   0x3   :  { %v35_v8 = vadd.f32 %v18_v6, %v15_v5  ;;  %v49_v9 = vsub.f32 %v18_v6, %v15_v5  ;;  %v16_v10 = vld [vmem:[%s624_s0 + $0x10] sm:$0xff]  ;;  %v19_v11 = vld [vmem:[%s624_s0 + $0x28] sm:$0xff]  ;;  %v22_v12 = vld [vmem:[%s624_s0 + $0x40] sm:$0xff] }
   0x4   :  { %v33_v13 = vadd.f32 %v32_v3, %v20_v2  ;;  %v406_v14 = vmul.f32 0.28867513, %v47_v4  ;;  %v38_v15 = vadd.f32 %v19_v11, %v16_v10  ;;  %v51_v16 = vsub.f32 %v19_v11, %v16_v10 }
   0x5   :  { %v36_v17 = vadd.f32 %v35_v8, %v21_v7  ;;  %v408_v18 = vmul.f32 0.28867513, %v49_v9  ;;  %v353_v10 = vmov -1.0  }
   0x6   :  { %v34_v19 = vmul.f32 0.33333334, %v33_v13  ;;  %v39_v20 = vadd.f32 %v38_v15, %v22_v12  ;;  %v70_v21 = vmul.f32 %v406_v14, %v406_v14  ;;  %v414_v24 = vmul.f32 0.28867513, %v51_v16 }
   0x7   :  { %v37_v22 = vmul.f32 0.33333334, %v36_v17  ;;  %v71_v23 = vmul.f32 %v408_v18, %v408_v18 }
   0x8   :  { %v41_v25 = vsub.f32 %v20_v2, %v34_v19  ;;  %53 = vst [vmem:[%s625_s4] sm:$0xff] %v34_v19  ;;  %v40_v26 = vmul.f32 0.33333334, %v39_v20  ;;  %v73_v32 = vmul.f32 %v414_v24, %v414_v24 }
   0x9   :  { %v43_v27 = vsub.f32 %v21_v7, %v37_v22  ;;  %324 = vst [vmem:[%s625_s4 + $0x8] sm:$0xff] %v37_v22  ;;  %v72_v31 = vadd.f32 %v71_v23, %v70_v21 }
   0xa   :  { %v422_v28 = vmul.f32 0.5, %v41_v25  ;;  %v45_v29 = vsub.f32 %v22_v12, %v40_v26  ;;  %325 = vst [vmem:[%s625_s4 + $0x10] sm:$0xff] %v40_v26 }
   0xb   :  { %v427_v30 = vmul.f32 0.5, %v43_v27  ;;  %v74_v42 = vadd.f32 %v73_v32, %v72_v31 }
   0xc   :  { %v60_v33 = vmul.f32 %v406_v14, %v422_v28  ;;  %v65_v34 = vmul.f32 %v422_v28, %v422_v28  ;;  %v435_v35 = vmul.f32 0.5, %v45_v29 }
   0xd   :  { %v61_v36 = vmul.f32 %v408_v18, %v427_v30  ;;  %v66_v37 = vmul.f32 %v427_v30, %v427_v30 }
   0xe   :  { %v63_v38 = vmul.f32 %v414_v24, %v435_v35  ;;  %v68_v39 = vmul.f32 %v435_v35, %v435_v35 }
   0xf   :  { %v62_v40 = vadd.f32 %v61_v36, %v60_v33  ;;  %v67_v41 = vadd.f32 %v66_v37, %v65_v34 }
  0x11   :  { %v64_v43 = vadd.f32 %v63_v38, %v62_v40  ;;  %v69_v44 = vadd.f32 %v68_v39, %v67_v41 }
  0x13   :  { %v75_v45 = vadd.f32 %v64_v43, %v64_v43  ;;  %v76_v46 = vsub.f32 %v69_v44, %v74_v42 }
  0x15   :  { %v77_v47 = vmul.f32 %v76_v46, %v76_v46  ;;  %v78_v48 = vmul.f32 %v75_v45, %v75_v45 }
  0x17   :  { %v79_v49 = vadd.f32 %v78_v48, %v77_v47 }
  0x19   :  { %v80_v50 = vmax.f32 %v79_v49, 1e-30  ;;  %vm82_vm0 = vcmp.gt.f32.partialorder %v79_v49, 1e-30 }
  0x1b   :  { %343 = vrsqrt.f32 %v80_v50 }
  0x25   :  { %v344_v51 = vpop.eup %343 }
  0x26   :  { %v83_v52 = vmul.f32 %v344_v51, %v76_v46  ;;  %v85_v7 = vmul.f32 %v344_v51, %v75_v45 }
  0x28   :  { %v84_v53 = vsel %vm82_vm0, %v83_v52, 1.0  ;;  %v86_v9 = vsel %vm82_vm0, %v85_v7, 0.0 }
  0x29   :  { %v87_v54 = vadd.f32 1.0, %v84_v53  ;;  %v97_v55 = vsub.f32 1.0, %v84_v53  ;;  %vm107_vm5 = vcmp.ge.f32.partialorder %v84_v53, 0.0  ;;  %vm112_vm6 = vcmp.ge.f32.partialorder %v86_v9, 0.0 }
  0x2a   :  { %v113_v11 = vsel %vm112_vm6, 1.0, %v353_v10  ;;  %v114_v12 = vand.u32 2147483647, %v86_v9 }
  0x2b   :  { %v88_v56 = vmul.f32 0.5, %v87_v54  ;;  %v98_v57 = vmul.f32 0.5, %v97_v55 }
  0x2d   :  { %v89_v58 = vmax.f32 %v88_v56, 0.0  ;;  %v99_v59 = vmax.f32 %v98_v57, 0.0 }
  0x2f   :  { %345 = vrsqrt.f32 %v89_v58  ;;  %vm92_vm1 = vcmp.eq.f32.partialorder %v89_v58, inf  ;;  %v95_v61 = vand.u32 2147483648, %v89_v58  ;;  %vm94_vm2 = vcmp.eq.f32.partialorder %v89_v58, 0.0 }
  0x30   :  { %347 = vrsqrt.f32 %v99_v59  ;;  %vm102_vm3 = vcmp.eq.f32.partialorder %v99_v59, inf  ;;  %v105_v0 = vand.u32 2147483648, %v99_v59  ;;  %vm104_vm4 = vcmp.eq.f32.partialorder %v99_v59, 0.0 }
  0x39   :  { %v346_v60 = vpop.eup %345 }
  0x3a   :  { %v348_v62 = vpop.eup %347  ;;  %v91_v63 = vmul.f32 %v346_v60, %v89_v58  ;;  %v24_v60 = vld [vmem:[%s627_s1 + $0x8] sm:$0xff] }
  0x3b   :  { %v101_v1 = vmul.f32 %v348_v62, %v99_v59  ;;  %v25_v62 = vld [vmem:[%s627_s1 + $0x10] sm:$0xff] }
  0x3c   :  { %v93_v2 = vsel %vm92_vm1, %v89_v58, %v91_v63  ;;  %v27_v63 = vld [vmem:[%s627_s1 + $0x20] sm:$0xff] }
  0x3d   :  { %v96_v3 = vsel %vm94_vm2, %v95_v61, %v93_v2  ;;  %v103_v4 = vsel %vm102_vm3, %v99_v59, %v101_v1  ;;  %v23_v59 = vld [vmem:[%s627_s1] sm:$0xff]  ;;  %v26_v61 = vld [vmem:[%s627_s1 + $0x18] sm:$0xff] }
  0x3e   :  { %v106_v5 = vsel %vm104_vm4, %v105_v0, %v103_v4  ;;  %v28_v0 = vld [vmem:[%s627_s1 + $0x28] sm:$0xff] }
  0x3f   :  { %v108_v6 = vsel %vm107_vm5, %v96_v3, %v106_v5  ;;  %v118_v16 = vmul.f32 %v113_v11, %v106_v5 }
  0x40   :  { %v109_v8 = vmax.f32 %v108_v6, 1e-06 }
  0x42   :  { %349 = vrcp.f32 %v109_v8 }
  0x4c   :  { %v350_v13 = vpop.eup %349 }
  0x4d   :  { %v111_v15 = vmul.f32 0.5, %v350_v13 }
  0x4f   :  { %v115_v17 = vmul.f32 %v114_v12, %v111_v15  ;;  %v117_v19 = vmul.f32 %v111_v15, %v86_v9 }
  0x51   :  { %v116_v20 = vsel %vm107_vm5, %v96_v3, %v115_v17  ;;  %v119_v21 = vsel %vm107_vm5, %v117_v19, %v118_v16 }
  0x52   :  { %v120_v22 = vmul.f32 %v116_v20, %v422_v28  ;;  %v121_v23 = vmul.f32 %v119_v21, %v406_v14  ;;  %v123_v25 = vmul.f32 %v116_v20, %v427_v30  ;;  %v124_v26 = vmul.f32 %v119_v21, %v408_v18 }
  0x53   :  { %v126_v27 = vmul.f32 %v116_v20, %v435_v35  ;;  %v127_v29 = vmul.f32 %v119_v21, %v414_v24  ;;  %v129_v31 = vmul.f32 %v116_v20, %v406_v14  ;;  %v130_v32 = vmul.f32 %v119_v21, %v422_v28 }
  0x54   :  { %v122_v33 = vadd.f32 %v121_v23, %v120_v22  ;;  %v125_v34 = vadd.f32 %v124_v26, %v123_v25  ;;  %v132_v36 = vmul.f32 %v116_v20, %v408_v18  ;;  %v133_v37 = vmul.f32 %v119_v21, %v427_v30  ;;  %v29_v23 = vld [vmem:[%s627_s1 + $0x30] sm:$0xff]  ;;  %v30_v25 = vld [vmem:[%s627_s1 + $0x38] sm:$0xff]  ;;  %v31_v26 = vld [vmem:[%s627_s1 + $0x40] sm:$0xff] }
  0x55   :  { %v128_v38 = vadd.f32 %v127_v29, %v126_v27  ;;  %v131_v39 = vsub.f32 %v129_v31, %v130_v32  ;;  %v135_v40 = vmul.f32 %v116_v20, %v414_v24  ;;  %v136_v41 = vmul.f32 %v119_v21, %v435_v35 }
  0x56   :  { %v134_v42 = vsub.f32 %v132_v36, %v133_v37  ;;  %v462_v43 = vadd.f32 %v122_v33, %v122_v33  ;;  %v464_v44 = vadd.f32 %v125_v34, %v125_v34 }
  0x57   :  { %v137_v14 = vsub.f32 %v135_v40, %v136_v41  ;;  %v141_v45 = vmul.f32 %v131_v39, %v128_v38  ;;  %v145_v28 = vmul.f32 %v131_v39, %v125_v34  ;;  %v466_v46 = vadd.f32 %v128_v38, %v128_v38 }
  0x58   :  { %v139_v47 = vmul.f32 %v134_v42, %v128_v38  ;;  %v144_v18 = vmul.f32 %v134_v42, %v122_v33  ;;  %164 = vst [vmem:[%s626_s2] sm:$0xff] %v462_v43  ;;  %v472_v24 = vadd.f32 %v131_v39, %v131_v39  ;;  %328 = vst [vmem:[%s626_s2 + $0x18] sm:$0xff] %v464_v44 }
  0x59   :  { %v478_v30 = vadd.f32 %v134_v42, %v134_v42  ;;  %v138_v35 = vmul.f32 %v137_v14, %v125_v34  ;;  %v142_v48 = vmul.f32 %v137_v14, %v122_v33  ;;  %v480_v49 = vadd.f32 %v137_v14, %v137_v14  ;;  %331 = vst [vmem:[%s626_s2 + $0x30] sm:$0xff] %v466_v46 }
  0x5a   :  { %v146_v50 = vsub.f32 %v144_v18, %v145_v28  ;;  %326 = vst [vmem:[%s626_s2 + $0x8] sm:$0xff] %v472_v24  ;;  %v187_v1 = vmul.f32 %v462_v43, %v23_v59  ;;  %v188_v2 = vmul.f32 %v472_v24, %v26_v61  ;;  %v192_v3 = vmul.f32 %v462_v43, %v24_v60 }
  0x5b   :  { %329 = vst [vmem:[%s626_s2 + $0x20] sm:$0xff] %v478_v30  ;;  %v140_v51 = vsub.f32 %v138_v35, %v139_v47  ;;  %v143_v52 = vsub.f32 %v141_v45, %v142_v48  ;;  %332 = vst [vmem:[%s626_s2 + $0x38] sm:$0xff] %v480_v49  ;;  %v193_v4 = vmul.f32 %v472_v24, %v27_v63 }
  0x5c   :  { %v150_v55 = vmul.f32 %v146_v50, %v146_v50  ;;  %v197_v5 = vmul.f32 %v462_v43, %v25_v62  ;;  %v198_v6 = vmul.f32 %v472_v24, %v28_v0  ;;  %v202_v7 = vmul.f32 %v464_v44, %v23_v59 }
  0x5d   :  { %v147_v53 = vmul.f32 %v140_v51, %v140_v51  ;;  %v148_v54 = vmul.f32 %v143_v52, %v143_v52  ;;  %v203_v8 = vmul.f32 %v478_v30, %v26_v61  ;;  %v207_v9 = vmul.f32 %v464_v44, %v24_v60 }
  0x5e   :  { %v208_v10 = vmul.f32 %v478_v30, %v27_v63  ;;  %v212_v11 = vmul.f32 %v464_v44, %v25_v62  ;;  %v213_v12 = vmul.f32 %v478_v30, %v28_v0  ;;  %v217_v13 = vmul.f32 %v466_v46, %v23_v59 }
  0x5f   :  { %v149_v56 = vadd.f32 %v148_v54, %v147_v53  ;;  %v218_v15 = vmul.f32 %v480_v49, %v26_v61  ;;  %v222_v17 = vmul.f32 %v466_v46, %v24_v60  ;;  %v223_v19 = vmul.f32 %v480_v49, %v27_v63 }
  0x60   :  { %v227_v20 = vmul.f32 %v466_v46, %v25_v62  ;;  %v228_v21 = vmul.f32 %v480_v49, %v28_v0  ;;  %v189_v27 = vadd.f32 %v188_v2, %v187_v1  ;;  %v194_v29 = vadd.f32 %v193_v4, %v192_v3 }
  0x61   :  { %v151_v57 = vadd.f32 %v150_v55, %v149_v56  ;;  %v199_v31 = vadd.f32 %v198_v6, %v197_v5  ;;  %v204_v32 = vadd.f32 %v203_v8, %v202_v7  ;;  %v209_v37 = vadd.f32 %v208_v10, %v207_v9 }
  0x62   :  { %v214_v38 = vadd.f32 %v213_v12, %v212_v11  ;;  %v219_v39 = vadd.f32 %v218_v15, %v217_v13  ;;  %v224_v40 = vadd.f32 %v223_v19, %v222_v17  ;;  %v229_v41 = vadd.f32 %v228_v21, %v227_v20 }
  0x63   :  { %v152_v58 = vmax.f32 %v151_v57, 1e-24 }
  0x65   :  { %351 = vrsqrt.f32 %v152_v58 }
  0x6f   :  { %v352_v16 = vpop.eup %351 }
  0x70   :  { %v154_v22 = vmul.f32 0.001, %v352_v16 }
  0x72   :  { %v543_v33 = vmul.f32 %v154_v22, %v140_v51  ;;  %v545_v34 = vmul.f32 %v154_v22, %v143_v52  ;;  %v547_v36 = vmul.f32 %v154_v22, %v146_v50 }
  0x74   :  { %327 = vst [vmem:[%s626_s2 + $0x10] sm:$0xff] %v543_v33  ;;  %330 = vst [vmem:[%s626_s2 + $0x28] sm:$0xff] %v545_v34  ;;  %v190_v42 = vmul.f32 %v543_v33, %v29_v23  ;;  %v195_v14 = vmul.f32 %v543_v33, %v30_v25  ;;  %v200_v45 = vmul.f32 %v543_v33, %v31_v26 }
  0x75   :  { %333 = vst [vmem:[%s626_s2 + $0x40] sm:$0xff] %v547_v36  ;;  %v205_v28 = vmul.f32 %v545_v34, %v29_v23  ;;  %v210_v47 = vmul.f32 %v545_v34, %v30_v25  ;;  %v215_v18 = vmul.f32 %v545_v34, %v31_v26  ;;  %v220_v35 = vmul.f32 %v547_v36, %v29_v23 }
  0x76   :  { %v225_v48 = vmul.f32 %v547_v36, %v30_v25  ;;  %v191_v50 = vadd.f32 %v190_v42, %v189_v27  ;;  %v196_v51 = vadd.f32 %v195_v14, %v194_v29  ;;  %v201_v52 = vadd.f32 %v200_v45, %v199_v31 }
  0x77   :  { %v206_v53 = vadd.f32 %v205_v28, %v204_v32  ;;  %v211_v54 = vadd.f32 %v210_v47, %v209_v37  ;;  %v216_v55 = vadd.f32 %v215_v18, %v214_v38  ;;  %v221_v56 = vadd.f32 %v220_v35, %v219_v39 }
  0x78   :  { %v226_v57 = vadd.f32 %v225_v48, %v224_v40  ;;  %v232_v58 = vmul.f32 %v191_v50, %v462_v43  ;;  %v233_v59 = vmul.f32 %v196_v51, %v472_v24  ;;  %v235_v60 = vmul.f32 %v201_v52, %v543_v33 }
  0x79   :  { %v238_v61 = vmul.f32 %v191_v50, %v464_v44  ;;  %v239_v62 = vmul.f32 %v196_v51, %v478_v30  ;;  %v241_v63 = vmul.f32 %v201_v52, %v545_v34  ;;  %v245_v0 = vmul.f32 %v191_v50, %v466_v46 }
  0x7a   :  { %v246_v1 = vmul.f32 %v196_v51, %v480_v49  ;;  %v234_v2 = vadd.f32 %v233_v59, %v232_v58  ;;  %v248_v3 = vmul.f32 %v201_v52, %v547_v36  ;;  %v252_v4 = vmul.f32 %v206_v53, %v462_v43 }
  0x7b   :  { %v253_v5 = vmul.f32 %v211_v54, %v472_v24  ;;  %v240_v6 = vadd.f32 %v239_v62, %v238_v61  ;;  %v255_v8 = vmul.f32 %v216_v55, %v543_v33  ;;  %v259_v9 = vmul.f32 %v206_v53, %v464_v44 }
  0x7c   :  { %v247_v7 = vadd.f32 %v246_v1, %v245_v0  ;;  %v236_v10 = vadd.f32 %v235_v60, %v234_v2  ;;  %v260_v12 = vmul.f32 %v211_v54, %v478_v30  ;;  %v262_v13 = vmul.f32 %v216_v55, %v545_v34 }
  0x7d   :  { %v254_v11 = vadd.f32 %v253_v5, %v252_v4  ;;  %v242_v15 = vadd.f32 %v241_v63, %v240_v6  ;;  %v266_v17 = vmul.f32 %v206_v53, %v466_v46  ;;  %v267_v19 = vmul.f32 %v211_v54, %v480_v49 }
  0x7e   :  { %v249_v16 = vadd.f32 %v248_v3, %v247_v7  ;;  %237 = vst [vmem:[%s628_s3] sm:$0xff] %v236_v10  ;;  %v261_v21 = vadd.f32 %v260_v12, %v259_v9  ;;  %v269_v22 = vmul.f32 %v216_v55, %v547_v36  ;;  %v230_v23 = vmul.f32 %v547_v36, %v31_v26 }
  0x7f   :  { %v256_v20 = vadd.f32 %v255_v8, %v254_v11  ;;  %334 = vst [vmem:[%s628_s3 + $0x8] sm:$0xff] %v242_v15  ;;  %v268_v25 = vadd.f32 %v267_v19, %v266_v17  ;;  %v273_v27 = vmul.f32 %v221_v56, %v462_v43  ;;  %v274_v29 = vmul.f32 %v226_v57, %v472_v24 }
  0x80   :  { %335 = vst [vmem:[%s628_s3 + $0x10] sm:$0xff] %v249_v16  ;;  %v280_v31 = vmul.f32 %v221_v56, %v464_v44  ;;  %v263_v26 = vadd.f32 %v262_v13, %v261_v21  ;;  %v231_v32 = vadd.f32 %v230_v23, %v229_v41  ;;  %v281_v37 = vmul.f32 %v226_v57, %v478_v30 }
  0x81   :  { %336 = vst [vmem:[%s628_s3 + $0x18] sm:$0xff] %v256_v20  ;;  %v287_v38 = vmul.f32 %v221_v56, %v466_v46  ;;  %v270_v39 = vadd.f32 %v269_v22, %v268_v25  ;;  %v275_v40 = vadd.f32 %v274_v29, %v273_v27  ;;  %v288_v42 = vmul.f32 %v226_v57, %v480_v49 }
  0x82   :  { %337 = vst [vmem:[%s628_s3 + $0x20] sm:$0xff] %v263_v26  ;;  %v276_v43 = vmul.f32 %v231_v32, %v543_v33  ;;  %v282_v44 = vadd.f32 %v281_v37, %v280_v31  ;;  %v283_v24 = vmul.f32 %v231_v32, %v545_v34  ;;  %v290_v14 = vmul.f32 %v231_v32, %v547_v36 }
  0x83   :  { %338 = vst [vmem:[%s628_s3 + $0x28] sm:$0xff] %v270_v39  ;;  %v289_v46 = vadd.f32 %v288_v42, %v287_v38 }
  0x84   :  { %v277_v30 = vadd.f32 %v276_v43, %v275_v40  ;;  %v284_v41 = vadd.f32 %v283_v24, %v282_v44 }
  0x85   :  { %v291_v45 = vadd.f32 %v290_v14, %v289_v46 }
  0x86   :  { %339 = vst [vmem:[%s628_s3 + $0x30] sm:$0xff] %v277_v30  ;;  %340 = vst [vmem:[%s628_s3 + $0x38] sm:$0xff] %v284_v41 }
  0x87   :  { %341 = vst [vmem:[%s628_s3 + $0x40] sm:$0xff] %v291_v45 }

</bundles_post_ra>
